<compile_context>
chip_gen: v7x
topology: tpu7x:2x2x1
jax: 0.10.0
libtpu: 0.0.40
codegen_flags: <defaults>
</compile_context>

<pallas_src>
import jax
import jax.numpy as jnp
from jax.experimental import pallas as pl
from jax.experimental.pallas import tpu as pltpu

EPS = 1e-14  # matches the PyTorch module


def _focal_loss_kernel(x_ref, t_ref, out_ref, acc_ref):
    """One (tile_b, N) tile of the focal loss.

    Grid = (n_par, tiles_per_core):
      axis 0 ("parallel")  -> independent output slot per TensorCore (v7x)
      axis 1 ("arbitrary") -> reduction over batch tiles
    """
    i = pl.program_id(1)

    @pl.when(i == 0)
    def _():
        acc_ref[...] = jnp.zeros_like(acc_ref)

    x = x_ref[...].astype(jnp.float32)
    t = t_ref[...].astype(jnp.float32)

    # Fused positive/negative branches (exactly matches the reference math):
    #   t == 1 : p_t = x      ->  -(1-x)^2 * log(x   + EPS)
    #   else   : p_t = 1 - x  ->  -x^2     * log(1-x + EPS)
    p_t = jnp.where(t == 1.0, x, 1.0 - x)
    one_m = 1.0 - p_t
    acc_ref[...] += -(one_m * one_m) * jnp.log(p_t + EPS)

    @pl.when(i == pl.num_programs(1) - 1)
    def _():
        # Single XLU reduction in the epilogue; broadcast the per-core partial
        # over a lane-dense (8, 128) output block (unmasked vst).
        partial = jnp.sum(acc_ref[...])
        out_ref[...] = jnp.full(out_ref.shape, partial, dtype=jnp.float32)


def _pick_tile_b(B, N, itemsize, target_bytes=2 * 1024 * 1024):
    """Largest multiple-of-8 divisor of B whose (tile_b, N) tile is <= target_bytes."""
    max_rows = max(8, target_bytes // max(1, N * itemsize))
    limit = min(B, max_rows)
    best = None
    t = 8
    while t <= limit:
        if B % t == 0:
            best = t
        t += 8
    if best is None:
        # No suitable divisor: put the whole batch in one block
        # (block_shape == full array dim is always legal).
        return B
    return best


def bce_focal_loss(inputs, targets):
    """reduction='mean' path: mean over batch of the per-row (dim-1) sums."""
    B, N = inputs.shape
    assert targets.shape == (B, N)

    itemsize = jnp.dtype(inputs.dtype).itemsize
    tile_b = _pick_tile_b(B, N, itemsize)
    n_tiles = B // tile_b  # _pick_tile_b returns a divisor of B (or B itself)

    # Split independent batch tiles across the 2 TensorCores on v7x.
    n_par = 2 if (n_tiles >= 2 and n_tiles % 2 == 0) else 1
    tiles_per_core = n_tiles // n_par

    in_spec = pl.BlockSpec((tile_b, N), lambda p, i: (p * tiles_per_core + i, 0))

    out = pl.pallas_call(
        _focal_loss_kernel,
        out_shape=jax.ShapeDtypeStruct((n_par, 8, 128), jnp.float32),
        grid_spec=pltpu.PrefetchScalarGridSpec(
            num_scalar_prefetch=0,
            grid=(n_par, tiles_per_core),
            in_specs=[in_spec, in_spec],
            out_specs=pl.BlockSpec((1, 8, 128), lambda p, i: (p, 0, 0)),
            scratch_shapes=[pltpu.VMEM((tile_b, N), jnp.float32)],
        ),
        compiler_params=pltpu.CompilerParams(
            dimension_semantics=("parallel", "arbitrary"),
            vmem_limit_bytes=32 * 1024 * 1024,
        ),
    )(inputs, targets)

    # mean over batch of per-row sums == total sum / B
    return jnp.sum(out[:, 0, 0]) / jnp.float32(B)


def bce_focal_loss_ref(inputs, targets):
    """Pure-JAX reference mirroring the PyTorch module."""
    pos_id = (targets == 1.0).astype(jnp.float32)
    neg_id = 1.0 - pos_id
    pos_loss = -pos_id * (1.0 - inputs) ** 2 * jnp.log(inputs + EPS)
    neg_loss = -neg_id * inputs ** 2 * jnp.log(1.0 - inputs + EPS)
    return jnp.mean(jnp.sum(pos_loss + neg_loss, axis=1))


if __name__ == "__main__":
    key = jax.random.PRNGKey(0)
    k1, k2 = jax.random.split(key)

    B, N = 16, 128  # e.g. batch=16, flattened S*S*B objectness confidences
    # predicted confidences in (0, 1)
    inputs = jax.nn.sigmoid(jax.random.normal(k1, (B, N), dtype=jnp.float32))
    # targets: mostly 0, some exactly 1.0 (objectness labels)
    targets = (jax.random.uniform(k2, (B, N)) > 0.8).astype(jnp.float32)

    out = bce_focal_loss(inputs, targets)
    out = jax.block_until_ready(out)

    ref = bce_focal_loss_ref(inputs, targets)
    assert jnp.allclose(out, ref, rtol=1e-4, atol=1e-5), (out, ref)

    print("KERNEL_OK")
</pallas_src>

<mosaic_0001>
module attributes {stable_mosaic.version = 11 : i64} {
  func.func @_focal_loss_kernel(%arg0: i32, %arg1: i32, %arg2: memref<16x128xf32, #tpu.memory_space<vmem>>, %arg3: memref<16x128xf32, #tpu.memory_space<vmem>>, %arg4: memref<1x8x128xf32, #tpu.memory_space<vmem>>, %arg5: memref<16x128xf32, #tpu.memory_space<vmem>>) attributes {dimension_semantics = [#tpu.dimension_semantics<parallel>, #tpu.dimension_semantics<arbitrary>], iteration_bounds = array<i64: 1, 1>, scalar_prefetch = 0 : i64, scratch_operands = 1 : i64, tpu.core_type = #tpu.core_type<tc>, window_params = [{transform_indices = @transform_0, window_bounds = array<i64: 16, 128>}, {transform_indices = @transform_1, window_bounds = array<i64: 16, 128>}, {transform_indices = @transform_2, window_bounds = array<i64: 1, 8, 128>}]} {
    %c0_i32 = arith.constant 0 : i32
    %0 = arith.cmpi eq, %arg1, %c0_i32 : i32
    %1 = arith.extui %0 : i1 to i32
    %c0_i32_0 = arith.constant 0 : i32
    %2 = arith.cmpi ne, %1, %c0_i32_0 : i32
    scf.if %2 {
      %cst_14 = arith.constant 0.000000e+00 : f32
      %25 = vector.broadcast %cst_14 : f32 to vector<16x128xf32>
      %c0_15 = arith.constant 0 : index
      %c0_16 = arith.constant 0 : index
      %26 = vector.load %arg5[%c0_15, %c0_16] : memref<16x128xf32, #tpu.memory_space<vmem>>, vector<16x128xf32>
      tpu.vector_store %arg5[%c0_15, %c0_16], %25 {strides = array<i32>} : memref<16x128xf32, #tpu.memory_space<vmem>>, vector<16x128xf32>,
    } else {
    }
    %c0 = arith.constant 0 : index
    %c0_1 = arith.constant 0 : index
    %3 = vector.load %arg2[%c0, %c0_1] : memref<16x128xf32, #tpu.memory_space<vmem>>, vector<16x128xf32>
    %c0_2 = arith.constant 0 : index
    %c0_3 = arith.constant 0 : index
    %4 = vector.load %arg3[%c0_2, %c0_3] : memref<16x128xf32, #tpu.memory_space<vmem>>, vector<16x128xf32>
    %cst = arith.constant 1.000000e+00 : f32
    %5 = vector.broadcast %cst : f32 to vector<16x128xf32>
    %6 = arith.cmpf oeq, %4, %5 : vector<16x128xf32>
    %cst_4 = arith.constant 1.000000e+00 : f32
    %7 = vector.broadcast %cst_4 : f32 to vector<16x128xf32>
    %8 = arith.subf %7, %3 : vector<16x128xf32>
    %9 = arith.select %6, %3, %8 : vector<16x128xi1>, vector<16x128xf32>
    %cst_5 = arith.constant 1.000000e+00 : f32
    %10 = vector.broadcast %cst_5 : f32 to vector<16x128xf32>
    %11 = arith.subf %10, %9 : vector<16x128xf32>
    %c0_6 = arith.constant 0 : index
    %c0_7 = arith.constant 0 : index
    %12 = vector.load %arg5[%c0_6, %c0_7] : memref<16x128xf32, #tpu.memory_space<vmem>>, vector<16x128xf32>
    %13 = arith.mulf %11, %11 : vector<16x128xf32>
    %cst_8 = arith.constant 0.000000e+00 : f32
    %14 = vector.broadcast %cst_8 : f32 to vector<16x128xf32>
    %15 = arith.subf %14, %13 : vector<16x128xf32>
    %cst_9 = arith.constant 9.99999982E-15 : f32
    %16 = vector.broadcast %cst_9 : f32 to vector<16x128xf32>
    %17 = arith.addf %9, %16 : vector<16x128xf32>
    %18 = math.log %17 : vector<16x128xf32>
    %19 = arith.mulf %15, %18 : vector<16x128xf32>
    %20 = arith.addf %12, %19 : vector<16x128xf32>
    %c0_10 = arith.constant 0 : index
    %c0_11 = arith.constant 0 : index
    %21 = vector.load %arg5[%c0_10, %c0_11] : memref<16x128xf32, #tpu.memory_space<vmem>>, vector<16x128xf32>
    tpu.vector_store %arg5[%c0_10, %c0_11], %20 {strides = array<i32>} : memref<16x128xf32, #tpu.memory_space<vmem>>, vector<16x128xf32>,
    %c0_i32_12 = arith.constant 0 : i32
    %22 = arith.cmpi eq, %arg1, %c0_i32_12 : i32
    %23 = arith.extui %22 : i1 to i32
    %c0_i32_13 = arith.constant 0 : i32
    %24 = arith.cmpi ne, %23, %c0_i32_13 : i32
    scf.if %24 {
      %c0_14 = arith.constant 0 : index
      %c0_15 = arith.constant 0 : index
      %25 = vector.load %arg5[%c0_14, %c0_15] : memref<16x128xf32, #tpu.memory_space<vmem>>, vector<16x128xf32>
      %26 = vector.shape_cast %25 : vector<16x128xf32> to vector<1x16x128xf32>
      %cst_16 = arith.constant dense<0.000000e+00> : vector<1xf32>
      %27 = vector.multi_reduction <add>, %26, %cst_16 [1, 2] : vector<1x16x128xf32> to vector<1xf32>
      %28 = vector.shape_cast %27 : vector<1xf32> to vector<1x1x1xf32>
      %29 = vector.extract %28[0, 0, 0] : f32 from vector<1x1x1xf32>
      %30 = vector.broadcast %29 : f32 to vector<1x8x128xf32>
      %c0_17 = arith.constant 0 : index
      %c0_18 = arith.constant 0 : index
      %c0_19 = arith.constant 0 : index
      %31 = vector.load %arg4[%c0_17, %c0_18, %c0_19] : memref<1x8x128xf32, #tpu.memory_space<vmem>>, vector<1x8x128xf32>
      tpu.vector_store %arg4[%c0_17, %c0_18, %c0_19], %30 {strides = array<i32>} : memref<1x8x128xf32, #tpu.memory_space<vmem>>, vector<1x8x128xf32>,
    } else {
    }
    return
  }
  func.func @transform_0(%arg0: i32, %arg1: i32) -> (i32, i32) {
    %c1_i32 = arith.constant 1 : i32
    %0 = arith.muli %arg0, %c1_i32 : i32
    %1 = arith.addi %0, %arg1 : i32
    %c0_i32 = arith.constant 0 : i32
    %c0_i32_0 = arith.constant 0 : i32
    return %1, %c0_i32 : i32, i32
  }
  func.func @transform_1(%arg0: i32, %arg1: i32) -> (i32, i32) {
    %c1_i32 = arith.constant 1 : i32
    %0 = arith.muli %arg0, %c1_i32 : i32
    %1 = arith.addi %0, %arg1 : i32
    %c0_i32 = arith.constant 0 : i32
    %c0_i32_0 = arith.constant 0 : i32
    return %1, %c0_i32 : i32, i32
  }
  func.func @transform_2(%arg0: i32, %arg1: i32) -> (i32, i32, i32) {
    %c0_i32 = arith.constant 0 : i32
    %c0_i32_0 = arith.constant 0 : i32
    %c0_i32_1 = arith.constant 0 : i32
    return %arg0, %c0_i32, %c0_i32_0 : i32, i32, i32
  }
}

</mosaic_0001>

<bundles_post_ra>
// kernel: tpu_custom_call.1
= control target key start
LH: loop header
LB: loop body
LE: loop exit
PB: predicated region body
PF: predicated region fallthrough
CT: control target
= control target key end

     0   :  { %7 = vsyncpa [#allocation4], 0  ;;  %s260_s0 = inlined_call_operand.hbm [shape: f32[16,128], index: 0, kind: input, shape index: {}]   ;;  %s261_s1 = inlined_call_operand.hbm [shape: f32[16,128], index: 1, kind: input, shape index: {}]   ;;  %s262_s2 = inlined_call_operand.hbm [shape: f32[1,8,128], index: 2, kind: output, shape index: {}]  }
   0x1   :  { %8 = vsyncpa [#allocation7], 0 }
   0x2   :  { %9 = vsyncpa [#allocation5], 0  ;;  %s204_s9 = smov [#allocation3]   ;;  %s132_s13 = scalar_lea.hbm %s260_s0, 256 }
   0x3   :  { %s19_s10 = sshll.u32 %s204_s9, 4  ;;  %p133_p0 = scmp.ne.s32.totalorder %s260_s0, %s132_s13  ;;  %s20_s10 = int_to_ptr.vmem [resolvable:$true] %s19_s10 }
   0x4   :  { %p136_p1 = scmp.lt.u32.totalorder %s132_s13, %s260_s0 }
   0x6   :  { %p138_p2 = pnand %p136_p1, %p133_p0 }
   0x8   :  { %141 = shalt.err (!%p138_p2)
}
   0x9   :  { %s142_s18 = scalar_lea.vmem %s20_s10, 256  ;;  %p147_p4 = scmp.lt.s32.totalorder %s20_s10, %s20_s10 }
   0xa   :  { %p143_p3 = scmp.ne.s32.totalorder %s20_s10, %s142_s18  ;;  %p148_p5 = scmp.lt.s32.totalorder %s142_s18, %s142_s18 }
   0xc   :  { %p149_p6 = por %p148_p5, %p147_p4 }
   0xe   :  { %p150_p7 = pnand %p149_p6, %p143_p3 }
  0x10   :  { %153 = shalt.err (!%p150_p7)
}
  0x11   :  { %s205_s19 = smov 128   ;;  %s206_s20 = smov 8  }
  0x12   :  { %25 = dma.hbm_to_vmem [thread:$0]  %s260_s0, 256, %s20_s10, [#allocation4], %s205_s19, %s205_s19, %s206_s20  }
  0x13   :  { %s207_s23 = smov [#allocation6]   ;;  %s154_s27 = scalar_lea.hbm %s261_s1, 256 }
  0x14   :  { %s35_s24 = sshll.u32 %s207_s23, 4  ;;  %p155_p8 = scmp.ne.s32.totalorder %s261_s1, %s154_s27  ;;  %s36_s24 = int_to_ptr.vmem [resolvable:$true] %s35_s24 }
  0x15   :  { %p158_p9 = scmp.lt.u32.totalorder %s154_s27, %s261_s1 }
  0x17   :  { %p160_p10 = pnand %p158_p9, %p155_p8 }
  0x19   :  { %163 = shalt.err (!%p160_p10)
}
  0x1a   :  { %s164_s4 = scalar_lea.vmem %s36_s24, 256  ;;  %p169_p12 = scmp.lt.s32.totalorder %s36_s24, %s36_s24 }
  0x1b   :  { %p165_p11 = scmp.ne.s32.totalorder %s36_s24, %s164_s4  ;;  %p170_p13 = scmp.lt.s32.totalorder %s164_s4, %s164_s4 }
  0x1d   :  { %p171_p0 = por %p170_p13, %p169_p12 }
  0x1f   :  { %p172_p1 = pnand %p171_p0, %p165_p11 }
  0x21   :  { %175 = shalt.err (!%p172_p1)
}
  0x22   :  { %41 = dma.hbm_to_vmem [thread:$0]  %s261_s1, 256, %s36_s24, [#allocation7], %s205_s19, %s205_s19, %s206_s20  }
  0x23   :  { %198 = dma.done.wait [#allocation4], 256  }
  0x24   :  { %199 = vsyncadd [#allocation4], 4294967040 }
  0x25   :  { %200 = dma.done.wait [#allocation7], 256  }
  0x26   :  { %201 = vsyncadd [#allocation7], 4294967040  ;;  %v58_v0 = vld [vmem:[#allocation3] sm:$0xff]  ;;  %v59_v1 = vld [vmem:[#allocation3 + $0x8] sm:$0xff]  ;;  %s208_s1 = smov [#allocation8]  }
  0x27   :  { %v60_v2 = vld [vmem:[#allocation6] sm:$0xff]  ;;  %v61_v3 = vld [vmem:[#allocation6 + $0x8] sm:$0xff]  ;;  %v64_v4 = vsub.f32 1.0, %v58_v0  ;;  %v65_v5 = vsub.f32 1.0, %v59_v1  ;;  %s111_s6 = sshll.u32 %s208_s1, 4  ;;  %s112_s6 = int_to_ptr.vmem [resolvable:$true] %s111_s6 }
  0x28   :  { %vm62_vm0 = vcmp.eq.f32.partialorder %v60_v2, 1.0  ;;  %vm63_vm1 = vcmp.eq.f32.partialorder %v61_v3, 1.0  ;;  %s176_s8 = scalar_lea.vmem %s112_s6, 128  ;;  %p181_p3 = scmp.lt.s32.totalorder %s112_s6, %s112_s6 }
  0x29   :  { %v66_v6 = vsel %vm62_vm0, %v58_v0, %v64_v4  ;;  %v67_v7 = vsel %vm63_vm1, %v59_v1, %v65_v5  ;;  %p177_p2 = scmp.ne.s32.totalorder %s112_s6, %s176_s8  ;;  %p182_p4 = scmp.lt.s32.totalorder %s176_s8, %s176_s8 }
  0x2a   :  { %v76_v8 = vadd.f32 1e-14, %v66_v6  ;;  %v77_v9 = vadd.f32 1e-14, %v67_v7  ;;  %v68_v10 = vsub.f32 1.0, %v66_v6  ;;  %v69_v11 = vsub.f32 1.0, %v67_v7 }
  0x2b   :  { %p183_p5 = por %p182_p4, %p181_p3 }
  0x2c   :  { %128 = vlog2.f32 %v76_v8  ;;  %v72_v12 = vmul.f32 %v68_v10, %v68_v10  ;;  %v73_v13 = vmul.f32 %v69_v11, %v69_v11 }
  0x2d   :  { %130 = vlog2.f32 %v77_v9  ;;  %p184_p6 = pnand %p183_p5, %p177_p2 }
  0x2e   :  { %v74_v14 = vsub.f32 0.0, %v72_v12  ;;  %v75_v16 = vsub.f32 0.0, %v73_v13 }
  0x36   :  { %v129_v15 = vpop.eup %128 }
  0x37   :  { %v131_v17 = vpop.eup %130  ;;  %v79_v18 = vmul.f32 0.6931472, %v129_v15 }
  0x38   :  { %v81_v19 = vmul.f32 0.6931472, %v131_v17 }
  0x39   :  { %v82_v20 = vmul.f32 %v79_v18, %v74_v14 }
  0x3a   :  { %v83_v21 = vmul.f32 %v81_v19, %v75_v16 }
  0x3c   :  { %v93_v22 = vadd.f32 %v83_v21, %v82_v20 }
  0x3e   :  { %94 = vadd.xlane.f32.xlu0 %v93_v22 }
  0xcb   :  { %v95_v23 = vpop.xlane.xlu0 %94 }
  0xcc   :  { %v96_v24 = vrot.slane %v95_v23, 4 }
  0xce   :  { %v97_v25 = vadd.f32 %v96_v24, %v95_v23 }
  0xd0   :  { %v98_v26 = vrot.slane %v97_v25, 2 }
  0xd2   :  { %v99_v27 = vadd.f32 %v98_v26, %v97_v25 }
  0xd4   :  { %v100_v28 = vrot.slane %v99_v27, 1 }
  0xd6   :  { %v101_v29 = vadd.f32 %v100_v28, %v99_v27 }
  0xd8   :  { %121 = vpush %v101_v29 }
 0x109   :  { %s122_s7 = spop %121 }
 0x10a   :  { %v103_v30 = vstv %s122_s7 }
 0x10b   :  { %104 = vst [vmem:[#allocation8] sm:$0xff] %v103_v30 }
 0x10c   :  { %187 = shalt.err (!%p184_p6)
}
 0x10d   :  { %s188_s11 = scalar_lea.hbm %s262_s2, 128 }
 0x10e   :  { %p189_p7 = scmp.ne.s32.totalorder %s262_s2, %s188_s11  ;;  %p192_p8 = scmp.lt.u32.totalorder %s188_s11, %s262_s2 }
 0x110   :  { %p194_p9 = pnand %p192_p8, %p189_p7 }
 0x112   :  { %197 = shalt.err (!%p194_p9)
}
 0x113   :  { %114 = dma.vmem_to_hbm [thread:$0]  %s112_s6, 128, %s262_s2, [#allocation5]  }
 0x114   :  { %202 = dma.done.wait [#allocation5], 128  }
 0x115   :  { %203 = vsyncadd [#allocation5], 4294967168 }
 0x116   :  { %118 = vsyncpa [#allocation4], 1 }
 0x117   :  { %119 = vsyncpa [#allocation7], 1 }
 0x118   :  { %120 = vsyncpa [#allocation5], 1 }

</bundles_post_ra>
